<compile_context>
chip_gen: v7x
topology: tpu7x:2x2x1
jax: 0.10.0
libtpu: 0.0.40
codegen_flags: <defaults>
</compile_context>

<pallas_src>
import functools

import jax
import jax.numpy as jnp
from jax.experimental import pallas as pl
from jax.experimental.pallas import tpu as pltpu

N_STATES = 3
HIDDEN = 15
N_ACTIONS = 3

_CHUNK = 512        # lanes per in-kernel compute chunk (bounds vreg pressure)


def _round_up(n, m):
    return (n + m - 1) // m * m


def _cdiv(a, b):
    return (a + b - 1) // b


def _choose_tiling(batch, max_tile_b):
    """Few, large, lane-dense grid tiles.

    - >= 2 grid steps whenever the (padded) batch allows it, so v7x's two
      TensorCores both work under dimension_semantics=("parallel",).
    - tile is a multiple of the inner chunk; padding waste is O(n_tiles*_CHUNK)
      rows, never a full max_tile_b of dead rows.
    """
    bp128 = _round_up(max(batch, 1), 128)
    n_tiles = _cdiv(bp128, max_tile_b)
    if bp128 >= 2 * 128:
        n_tiles = max(n_tiles, 2)
    tile_b = _round_up(_cdiv(bp128, n_tiles), 128)
    if tile_b > _CHUNK:
        tile_b = _round_up(tile_b, _CHUNK)
    return n_tiles, tile_b, n_tiles * tile_b


def _net_kernel(xT_ref, w1_ref, b1_ref, w2T_ref, b2_ref, oT_ref, *,
                chunk, use_stride0_bcast):
    tb = oT_ref.shape[-1]
    n_chunks = tb // chunk

    w1 = w1_ref[...]                       # [HIDDEN, N_STATES]  (PyTorch [out, in])
    w2T = w2T_ref[...]                     # [HIDDEN, N_ACTIONS]
    b2 = b2_ref[...]                       # [N_ACTIONS, 1]  (f32)

    # Hoisted once per grid step (JAX does not CSE broadcast_in_dim).
    b1_b = jnp.broadcast_to(b1_ref[...], (HIDDEN, chunk)).astype(jnp.float32)
    w1_cols = [w1[:, k:k + 1] for k in range(N_STATES)]     # each [HIDDEN, 1]
    w2_cols = [w2T[:, a:a + 1] for a in range(N_ACTIONS)]   # each [HIDDEN, 1]
    b2_rows = [b2[a:a + 1, :] for a in range(N_ACTIONS)]    # each [1, 1]

    # Static loop over 128-aligned lane chunks: each iteration ends with stores,
    # keeping the live set to a handful of vregs even for very large tiles.
    for c in range(n_chunks):
        lo = c * chunk                     # static, multiple of 128

        # ---- fc1: h[j,b] = b1[j] + sum_k w1[j,k] * x[b,k]   (K=3, VPU MACs) ----
        h = b1_b
        if use_stride0_bcast:
            # Sublane-broadcast of x row k done on the vector-load slot.
            for k in range(N_STATES):
                xk = xT_ref[pl.ds(k, HIDDEN, stride=0), pl.ds(lo, chunk)]
                h = h + w1_cols[k] * xk
        else:
            x_c = xT_ref[:, pl.ds(lo, chunk)]               # [N_STATES, chunk]
            for k in range(N_STATES):
                h = h + w1_cols[k] * x_c[k:k + 1, :]        # [15,1] * [1,chunk]
        h = jnp.maximum(h, 0.0)                             # ReLU

        # ---- out: y[a,b] = b2[a] + sum_j w2[a,j] * h[j,b]   (K=15) ----
        # Per-action full-width multiply + cross-sublane reduce (XLU), instead
        # of 15 broadcast-MACs on a 3-sublane accumulator (VALU-bound).
        for a in range(N_ACTIONS):
            ya = jnp.sum(w2_cols[a] * h, axis=0, keepdims=True) + b2_rows[a]
            oT_ref[pl.ds(a, 1), pl.ds(lo, chunk)] = ya.astype(oT_ref.dtype)  # lane-dense


@functools.partial(
    jax.jit, static_argnames=("max_tile_b", "compute_dtype", "use_stride0_bcast"))
def net_forward_fm(xT, w1, b1, w2, b2, *, max_tile_b=8192, compute_dtype=None,
                   use_stride0_bcast=False):
    """Feature-major forward: xT is [N_STATES, B]; returns [N_ACTIONS, B].

    w1: [HIDDEN, N_STATES], b1: [HIDDEN], w2: [N_ACTIONS, HIDDEN], b2: [N_ACTIONS]
    (PyTorch [out, in] layout).  compute_dtype=jnp.bfloat16 is recommended on
    v6e/v7x (f32 accumulation is kept in-kernel); leave None (f32) on v5e.
    """
    B = xT.shape[1]
    out_dtype = xT.dtype
    cdt = jnp.dtype(compute_dtype) if compute_dtype is not None else jnp.dtype(out_dtype)

    n_tiles, tile_b, Bp = _choose_tiling(B, max_tile_b)
    chunk = min(_CHUNK, tile_b)

    # Layout plumbing stays inside this jit so XLA fuses it with neighbors.
    xTp = jnp.pad(xT, ((0, 0), (0, Bp - B))).astype(cdt)            # [N_STATES, Bp]
    w1c = w1.astype(cdt)                                            # [HIDDEN, N_STATES]
    w2T = w2.T.astype(cdt)                                          # [HIDDEN, N_ACTIONS]
    b1c = jnp.asarray(b1, jnp.float32).reshape(HIDDEN, 1)
    b2c = jnp.asarray(b2, jnp.float32).reshape(N_ACTIONS, 1)

    isz = jnp.dtype(cdt).itemsize
    flops = 2 * Bp * (N_STATES * HIDDEN + HIDDEN * N_ACTIONS)
    bytes_accessed = (Bp * N_STATES * isz
                      + Bp * N_ACTIONS * jnp.dtype(out_dtype).itemsize
                      + (HIDDEN * N_STATES + HIDDEN * N_ACTIONS) * isz
                      + (HIDDEN + N_ACTIONS) * 4)

    def _resident(shape):
        # Full-array block with a constant index map: copied to VMEM once and
        # reused across grid steps (block index never changes).
        return pl.BlockSpec(shape, lambda i: (0,) * len(shape))

    kernel = functools.partial(_net_kernel, chunk=chunk,
                               use_stride0_bcast=use_stride0_bcast)

    oT = pl.pallas_call(
        kernel,
        out_shape=jax.ShapeDtypeStruct((N_ACTIONS, Bp), out_dtype),
        grid=(n_tiles,),
        in_specs=[
            pl.BlockSpec((N_STATES, tile_b), lambda i: (0, i)),   # x tile (pipelined)
            _resident((HIDDEN, N_STATES)),                        # w1  (VMEM-resident)
            _resident((HIDDEN, 1)),                               # b1
            _resident((HIDDEN, N_ACTIONS)),                       # w2^T
            _resident((N_ACTIONS, 1)),                            # b2
        ],
        out_specs=pl.BlockSpec((N_ACTIONS, tile_b), lambda i: (0, i)),
        compiler_params=pltpu.CompilerParams(
            dimension_semantics=("parallel",)),   # v7x: shard batch tiles over 2 TCs
        cost_estimate=pl.CostEstimate(
            flops=flops, transcendentals=0, bytes_accessed=bytes_accessed),
    )(xTp, w1c, b1c, w2T, b2c)

    return oT[:, :B]


@functools.partial(
    jax.jit, static_argnames=("max_tile_b", "compute_dtype", "use_stride0_bcast"))
def net_forward(x, w1, b1, w2, b2, *, max_tile_b=8192, compute_dtype=None,
                use_stride0_bcast=False):
    """PyTorch-layout forward: x [B, N_STATES] -> [B, N_ACTIONS]."""
    oT = net_forward_fm(x.T, w1, b1, w2, b2, max_tile_b=max_tile_b,
                        compute_dtype=compute_dtype,
                        use_stride0_bcast=use_stride0_bcast)
    return oT.T


def init_params(key):
    """PyTorch-style init: weights ~ Normal(0, 0.1) (as in Net.__init__),
    biases use nn.Linear's default Uniform(-1/sqrt(fan_in), 1/sqrt(fan_in))."""
    k1, k2, k3, k4 = jax.random.split(key, 4)
    w1 = 0.1 * jax.random.normal(k1, (HIDDEN, N_STATES), jnp.float32)
    b1 = jax.random.uniform(k2, (HIDDEN,), jnp.float32,
                            minval=-1.0 / jnp.sqrt(N_STATES),
                            maxval=1.0 / jnp.sqrt(N_STATES))
    w2 = 0.1 * jax.random.normal(k3, (N_ACTIONS, HIDDEN), jnp.float32)
    b2 = jax.random.uniform(k4, (N_ACTIONS,), jnp.float32,
                            minval=-1.0 / jnp.sqrt(HIDDEN),
                            maxval=1.0 / jnp.sqrt(HIDDEN))
    return w1, b1, w2, b2


if __name__ == "__main__":
    key = jax.random.PRNGKey(0)
    kx, kx2, kp = jax.random.split(key, 3)
    w1, b1, w2, b2 = init_params(kp)

    def ref_net(xx):
        # Pure-JAX reference with PyTorch semantics: relu(x @ W1^T + b1) @ W2^T + b2.
        return jnp.maximum(xx @ w1.T + b1, 0.0) @ w2.T + b2

    # Small demo batch (padded internally to one lane-dense 128-wide tile).
    B = 4
    x = jax.random.normal(kx, (B, N_STATES), jnp.float32)
    out = net_forward(x, w1, b1, w2, b2)
    jax.block_until_ready(out)
    assert out.shape == (B, N_ACTIONS)
    assert jnp.allclose(out, ref_net(x), atol=1e-5, rtol=1e-5), "mismatch (small batch)"

    # Also exercise the multi-tile / multi-chunk / ragged-padding path
    # (grid=(2,), tile_b=1536, 3 x 512-lane chunks per tile).
    B2 = 2500
    x2 = jax.random.normal(kx2, (B2, N_STATES), jnp.float32)
    out2 = net_forward(x2, w1, b1, w2, b2)
    jax.block_until_ready(out2)
    assert out2.shape == (B2, N_ACTIONS)
    assert jnp.allclose(out2, ref_net(x2), atol=1e-4, rtol=1e-4), "mismatch (large batch)"

    print("KERNEL_OK")
</pallas_src>

<mosaic_0001>
module attributes {stable_mosaic.version = 11 : i64} {
  func.func @_net_kernel(%arg0: i32, %arg1: memref<3x128xf32, #tpu.memory_space<vmem>>, %arg2: memref<15x3xf32, #tpu.memory_space<vmem>>, %arg3: memref<15x1xf32, #tpu.memory_space<vmem>>, %arg4: memref<15x3xf32, #tpu.memory_space<vmem>>, %arg5: memref<3x1xf32, #tpu.memory_space<vmem>>, %arg6: memref<3x128xf32, #tpu.memory_space<vmem>>) attributes {dimension_semantics = [#tpu.dimension_semantics<parallel>], iteration_bounds = array<i64: 1>, scalar_prefetch = 0 : i64, scratch_operands = 0 : i64, tpu.core_type = #tpu.core_type<tc>, window_params = [{transform_indices = @transform_0, window_bounds = array<i64: 3, 128>}, {pipeline_mode = #tpu.pipeline_mode<synchronous>, transform_indices = @transform_1, window_bounds = array<i64: 15, 3>}, {pipeline_mode = #tpu.pipeline_mode<synchronous>, transform_indices = @transform_2, window_bounds = array<i64: 15, 1>}, {pipeline_mode = #tpu.pipeline_mode<synchronous>, transform_indices = @transform_3, window_bounds = array<i64: 15, 3>}, {pipeline_mode = #tpu.pipeline_mode<synchronous>, transform_indices = @transform_4, window_bounds = array<i64: 3, 1>}, {transform_indices = @transform_5, window_bounds = array<i64: 3, 128>}]} {
    %c0 = arith.constant 0 : index
    %c0_0 = arith.constant 0 : index
    %0 = vector.load %arg2[%c0, %c0_0] : memref<15x3xf32, #tpu.memory_space<vmem>>, vector<15x3xf32>
    %c0_1 = arith.constant 0 : index
    %c0_2 = arith.constant 0 : index
    %1 = vector.load %arg4[%c0_1, %c0_2] : memref<15x3xf32, #tpu.memory_space<vmem>>, vector<15x3xf32>
    %c0_3 = arith.constant 0 : index
    %c0_4 = arith.constant 0 : index
    %2 = vector.load %arg5[%c0_3, %c0_4] : memref<3x1xf32, #tpu.memory_space<vmem>>, vector<3x1xf32>
    %c0_5 = arith.constant 0 : index
    %c0_6 = arith.constant 0 : index
    %3 = vector.load %arg3[%c0_5, %c0_6] : memref<15x1xf32, #tpu.memory_space<vmem>>, vector<15x1xf32>
    %4 = vector.shape_cast %3 : vector<15x1xf32> to vector<15x1xf32>
    %5 = vector.broadcast %4 : vector<15x1xf32> to vector<15x128xf32>
    %6 = vector.extract_strided_slice %0 {offsets = [0, 0], sizes = [15, 1], strides = [1, 1]} : vector<15x3xf32> to vector<15x1xf32>
    %7 = vector.extract_strided_slice %0 {offsets = [0, 1], sizes = [15, 1], strides = [1, 1]} : vector<15x3xf32> to vector<15x1xf32>
    %8 = vector.extract_strided_slice %0 {offsets = [0, 2], sizes = [15, 1], strides = [1, 1]} : vector<15x3xf32> to vector<15x1xf32>
    %9 = vector.extract_strided_slice %1 {offsets = [0, 0], sizes = [15, 1], strides = [1, 1]} : vector<15x3xf32> to vector<15x1xf32>
    %10 = vector.extract_strided_slice %1 {offsets = [0, 1], sizes = [15, 1], strides = [1, 1]} : vector<15x3xf32> to vector<15x1xf32>
    %11 = vector.extract_strided_slice %1 {offsets = [0, 2], sizes = [15, 1], strides = [1, 1]} : vector<15x3xf32> to vector<15x1xf32>
    %12 = vector.extract_strided_slice %2 {offsets = [0, 0], sizes = [1, 1], strides = [1, 1]} : vector<3x1xf32> to vector<1x1xf32>
    %13 = vector.extract_strided_slice %2 {offsets = [1, 0], sizes = [1, 1], strides = [1, 1]} : vector<3x1xf32> to vector<1x1xf32>
    %14 = vector.extract_strided_slice %2 {offsets = [2, 0], sizes = [1, 1], strides = [1, 1]} : vector<3x1xf32> to vector<1x1xf32>
    %c0_7 = arith.constant 0 : index
    %c0_8 = arith.constant 0 : index
    %15 = vector.load %arg1[%c0_7, %c0_8] : memref<3x128xf32, #tpu.memory_space<vmem>>, vector<3x128xf32>
    %16 = vector.extract_strided_slice %15 {offsets = [0, 0], sizes = [1, 128], strides = [1, 1]} : vector<3x128xf32> to vector<1x128xf32>
    %17 = vector.broadcast %6 : vector<15x1xf32> to vector<15x128xf32>
    %18 = vector.broadcast %16 : vector<1x128xf32> to vector<15x128xf32>
    %19 = arith.mulf %17, %18 : vector<15x128xf32>
    %20 = arith.addf %5, %19 : vector<15x128xf32>
    %21 = vector.extract_strided_slice %15 {offsets = [1, 0], sizes = [1, 128], strides = [1, 1]} : vector<3x128xf32> to vector<1x128xf32>
    %22 = vector.broadcast %7 : vector<15x1xf32> to vector<15x128xf32>
    %23 = vector.broadcast %21 : vector<1x128xf32> to vector<15x128xf32>
    %24 = arith.mulf %22, %23 : vector<15x128xf32>
    %25 = arith.addf %20, %24 : vector<15x128xf32>
    %26 = vector.extract_strided_slice %15 {offsets = [2, 0], sizes = [1, 128], strides = [1, 1]} : vector<3x128xf32> to vector<1x128xf32>
    %27 = vector.broadcast %8 : vector<15x1xf32> to vector<15x128xf32>
    %28 = vector.broadcast %26 : vector<1x128xf32> to vector<15x128xf32>
    %29 = arith.mulf %27, %28 : vector<15x128xf32>
    %30 = arith.addf %25, %29 : vector<15x128xf32>
    %cst = arith.constant 0.000000e+00 : f32
    %31 = vector.broadcast %cst : f32 to vector<15x128xf32>
    %32 = arith.maximumf %30, %31 : vector<15x128xf32>
    %33 = vector.broadcast %9 : vector<15x1xf32> to vector<15x128xf32>
    %34 = arith.mulf %33, %32 : vector<15x128xf32>
    %cst_9 = arith.constant dense<0.000000e+00> : vector<128xf32>
    %35 = vector.multi_reduction <add>, %34, %cst_9 [0] : vector<15x128xf32> to vector<128xf32>
    %36 = vector.shape_cast %35 : vector<128xf32> to vector<1x128xf32>
    %37 = vector.broadcast %12 : vector<1x1xf32> to vector<1x128xf32>
    %38 = arith.addf %36, %37 : vector<1x128xf32>
    %c0_10 = arith.constant 0 : index
    %c0_11 = arith.constant 0 : index
    %39 = vector.load %arg6[%c0_10, %c0_11] : memref<3x128xf32, #tpu.memory_space<vmem>>, vector<1x128xf32>
    tpu.vector_store %arg6[%c0_10, %c0_11], %38 {strides = array<i32>} : memref<3x128xf32, #tpu.memory_space<vmem>>, vector<1x128xf32>,
    %40 = vector.broadcast %10 : vector<15x1xf32> to vector<15x128xf32>
    %41 = arith.mulf %40, %32 : vector<15x128xf32>
    %cst_12 = arith.constant dense<0.000000e+00> : vector<128xf32>
    %42 = vector.multi_reduction <add>, %41, %cst_12 [0] : vector<15x128xf32> to vector<128xf32>
    %43 = vector.shape_cast %42 : vector<128xf32> to vector<1x128xf32>
    %44 = vector.broadcast %13 : vector<1x1xf32> to vector<1x128xf32>
    %45 = arith.addf %43, %44 : vector<1x128xf32>
    %c1 = arith.constant 1 : index
    %c0_13 = arith.constant 0 : index
    %46 = vector.load %arg6[%c1, %c0_13] : memref<3x128xf32, #tpu.memory_space<vmem>>, vector<1x128xf32>
    tpu.vector_store %arg6[%c1, %c0_13], %45 {strides = array<i32>} : memref<3x128xf32, #tpu.memory_space<vmem>>, vector<1x128xf32>,
    %47 = vector.broadcast %11 : vector<15x1xf32> to vector<15x128xf32>
    %48 = arith.mulf %47, %32 : vector<15x128xf32>
    %cst_14 = arith.constant dense<0.000000e+00> : vector<128xf32>
    %49 = vector.multi_reduction <add>, %48, %cst_14 [0] : vector<15x128xf32> to vector<128xf32>
    %50 = vector.shape_cast %49 : vector<128xf32> to vector<1x128xf32>
    %51 = vector.broadcast %14 : vector<1x1xf32> to vector<1x128xf32>
    %52 = arith.addf %50, %51 : vector<1x128xf32>
    %c2 = arith.constant 2 : index
    %c0_15 = arith.constant 0 : index
    %53 = vector.load %arg6[%c2, %c0_15] : memref<3x128xf32, #tpu.memory_space<vmem>>, vector<1x128xf32>
    tpu.vector_store %arg6[%c2, %c0_15], %52 {strides = array<i32>} : memref<3x128xf32, #tpu.memory_space<vmem>>, vector<1x128xf32>,
    return
  }
  func.func @transform_0(%arg0: i32) -> (i32, i32) {
    %c0_i32 = arith.constant 0 : i32
    %c0_i32_0 = arith.constant 0 : i32
    return %c0_i32, %arg0 : i32, i32
  }
  func.func @transform_1(%arg0: i32) -> (i32, i32) {
    %c0_i32 = arith.constant 0 : i32
    %c0_i32_0 = arith.constant 0 : i32
    %c0_i32_1 = arith.constant 0 : i32
    return %c0_i32, %c0_i32_0 : i32, i32
  }
  func.func @transform_2(%arg0: i32) -> (i32, i32) {
    %c0_i32 = arith.constant 0 : i32
    %c0_i32_0 = arith.constant 0 : i32
    %c0_i32_1 = arith.constant 0 : i32
    return %c0_i32, %c0_i32_0 : i32, i32
  }
  func.func @transform_3(%arg0: i32) -> (i32, i32) {
    %c0_i32 = arith.constant 0 : i32
    %c0_i32_0 = arith.constant 0 : i32
    %c0_i32_1 = arith.constant 0 : i32
    return %c0_i32, %c0_i32_0 : i32, i32
  }
  func.func @transform_4(%arg0: i32) -> (i32, i32) {
    %c0_i32 = arith.constant 0 : i32
    %c0_i32_0 = arith.constant 0 : i32
    %c0_i32_1 = arith.constant 0 : i32
    return %c0_i32, %c0_i32_0 : i32, i32
  }
  func.func @transform_5(%arg0: i32) -> (i32, i32) {
    %c0_i32 = arith.constant 0 : i32
    %c0_i32_0 = arith.constant 0 : i32
    return %c0_i32, %arg0 : i32, i32
  }
}

</mosaic_0001>

<bundles_post_ra>
// kernel: net_forward_fm.1
= control target key start
LH: loop header
LB: loop body
LE: loop exit
PB: predicated region body
PF: predicated region fallthrough
CT: control target
= control target key end

     0   :  { %v213_v2 = vmov 0   ;;  %s286_s0 = inlined_call_operand.vmem [shape: f32[3,128], index: 0, kind: input, shape index: {}]   ;;  %s287_s1 = inlined_call_operand.vmem [shape: f32[15,3], index: 1, kind: input, shape index: {}]   ;;  %s288_s2 = inlined_call_operand.vmem [shape: f32[15,1], index: 2, kind: input, shape index: {}]   ;;  %s289_s3 = inlined_call_operand.vmem [shape: f32[15,3], index: 3, kind: input, shape index: {}]   ;;  %s290_s4 = inlined_call_operand.vmem [shape: f32[3,1], index: 4, kind: input, shape index: {}]   ;;  %s291_s5 = inlined_call_operand.hbm [shape: f32[3,128], index: 5, kind: output, shape index: {}]  }
   0x1   :  { %v27_v0 = vld [vmem:[%s288_s2 + $0x8] sm:$0x7f]  ;;  %178 = vset.pattern.permute.xlu1 %v213_v2  ;;  %177 = vset.pattern.permute.xlu0 %v213_v2  ;;  %v21_v3 = vld [vmem:[%s287_s1] sm:$0xff] }
   0x2   :  { %v22_v1 = vld [vmem:[%s287_s1 + $0x8] sm:$0x7f]  ;;  %35 = vperm.xlu1 %178, %v27_v0  }
   0x3   :  { %46 = vperm.xlu0 %177, %v22_v1  }
   0x4   :  { %10 = vsyncpa [#allocation3], 0  ;;  %v214_v4 = vmov 1   ;;  %v26_v5 = vld [vmem:[%s288_s2] sm:$0xff]  ;;  %v215_v6 = vmov 2   ;;  %v49_v10 = vlaneseq  ;;  %vm103_vm0 = vcmask 1046528  }
   0x5   :  { %v24_v7 = vld [vmem:[%s289_s3 + $0x8] sm:$0x7f]  ;;  %v23_v8 = vld [vmem:[%s289_s3] sm:$0xff] }
   0x6   :  { %179 = vset.pattern.permute.xlu1 %v214_v4  ;;  %v25_v9 = vld [vmem:[%s290_s4] sm:$0x7]  ;;  %v50_v11 = vshrl.u32 %v49_v10, 7 }
   0x7   :  { %41 = vperm.xlu0 %177, %v21_v3   ;;  %62 = vperm.xlu1 %179, %v22_v1   ;;  %v38_v15 = vld [vmem:[%s286_s0] sm:$0x7]  ;;  %s216_s0 = smov [#allocation2]  }
   0x8   :  { %v51_v13 = vsub.s32 0, %v50_v11  ;;  %v67_v16 = vsub.s32 1, %v50_v11  ;;  %v83_v21 = vsub.s32 2, %v50_v11  ;;  %s165_s4 = sshll.u32 %s216_s0, 4  ;;  %s166_s4 = int_to_ptr.vmem [resolvable:$true] %s165_s4 }
   0x9   :  { %s189_s6 = scalar_lea.vmem %s166_s4, 64  ;;  %p194_p1 = scmp.lt.s32.totalorder %s166_s4, %s166_s4 }
   0xa   :  { %v52_v17 = vrot.slane %v38_v15, %v51_v13  ;;  %v68_v20 = vrot.slane %v38_v15, %v67_v16  ;;  %v84_v27 = vrot.slane %v38_v15, %v83_v21  ;;  %p190_p0 = scmp.ne.s32.totalorder %s166_s4, %s189_s6  ;;  %p195_p2 = scmp.lt.s32.totalorder %s189_s6, %s189_s6 }
   0xb   :  { %30 = vperm.xlu0 %177, %v26_v5   ;;  %58 = vperm.xlu1 %179, %v21_v3  }
   0xc   :  { %p196_p3 = por %p195_p2, %p194_p1 }
   0xe   :  { %p197_p4 = pnand %p196_p3, %p190_p0 }
   0xf   :  { %180 = vset.pattern.permute.xlu0 %v215_v6  ;;  %181 = vset.pattern.permute.xlu1 %v215_v6 }
  0x10   :  { %78 = vperm.xlu0 %180, %v22_v1   ;;  %74 = vperm.xlu1 %181, %v21_v3  }
  0x14   :  { %183 = vset.pattern.permute.xlu0 %v214_v4  ;;  %182 = vset.pattern.permute.xlu1 %v213_v2 }
  0x15   :  { %124 = vperm.xlu0 %183, %v24_v7   ;;  %98 = vperm.xlu1 %182, %v24_v7  }
  0x19   :  { %120 = vperm.xlu0 %183, %v23_v8   ;;  %184 = vset.pattern.permute.xlu1 %v215_v6 }
  0x1a   :  { %144 = vperm.xlu1 %184, %v24_v7  }
  0x1d   :  { %187 = vset.pattern.permute.xlu0 %v213_v2 }
  0x1e   :  { %114 = vperm.xlu0 %187, %v25_v9   ;;  %185 = vset.pattern.permute.xlu1 %v213_v2 }
  0x1f   :  { %93 = vperm.xlu1 %185, %v23_v8  }
  0x22   :  { %188 = vset.pattern.permute.xlu0 %v215_v6 }
  0x23   :  { %186 = vset.pattern.permute.xlu1 %v215_v6 }
  0x24   :  { %140 = vperm.xlu1 %186, %v23_v8  }
  0x81   :  { %v36_v12 = vpop.permute.xlu1 %35 }
  0x82   :  { %v47_v14 = vpop.permute.xlu0 %46 }
  0x83   :  { %v54_v23 = vmul.f32 %v52_v17, %v47_v14 }
  0x85   :  { %v56_v30 = vadd.f32 %v54_v23, %v36_v12 }
  0x86   :  { %v42_v18 = vpop.permute.xlu0 %41  ;;  %v63_v19 = vpop.permute.xlu1 %62 }
  0x87   :  { %v53_v22 = vmul.f32 %v52_v17, %v42_v18  ;;  %v70_v26 = vmul.f32 %v68_v20, %v63_v19 }
  0x89   :  { %v72_v32 = vadd.f32 %v70_v26, %v56_v30 }
  0x8a   :  { %v31_v24 = vpop.permute.xlu0 %30  ;;  %v59_v25 = vpop.permute.xlu1 %58 }
  0x8b   :  { %v69_v28 = vmul.f32 %v68_v20, %v59_v25  ;;  %v55_v29 = vadd.f32 %v53_v22, %v31_v24 }
  0x8d   :  { %v71_v35 = vadd.f32 %v69_v28, %v55_v29 }
  0x8f   :  { %v79_v31 = vpop.permute.xlu0 %78  ;;  %v75_v34 = vpop.permute.xlu1 %74 }
  0x90   :  { %v86_v33 = vmul.f32 %v84_v27, %v79_v31  ;;  %v85_v36 = vmul.f32 %v84_v27, %v75_v34 }
  0x92   :  { %v88_v37 = vadd.f32 %v86_v33, %v72_v32  ;;  %v87_v38 = vadd.f32 %v85_v36, %v71_v35 }
  0x94   :  { %v90_v39 = vmax.f32 %v88_v37, 0.0  ;;  %v125_v40 = vpop.permute.xlu0 %124  ;;  %v99_v41 = vpop.permute.xlu1 %98  ;;  %v89_v43 = vmax.f32 %v87_v38, 0.0 }
  0x96   :  { %v128_v42 = vmul.f32 %v125_v40, %v90_v39  ;;  %v102_v49 = vmul.f32 %v99_v41, %v90_v39 }
  0x98   :  { %v121_v44 = vpop.permute.xlu0 %120  ;;  %v129_v46 = vsel %vm103_vm0, %v128_v42, 0.0  ;;  %v104_v54 = vsel %vm103_vm0, %v102_v49, 0.0 }
  0x99   :  { %v127_v45 = vmul.f32 %v121_v44, %v89_v43  ;;  %v145_v47 = vpop.permute.xlu1 %144 }
  0x9a   :  { %v148_v56 = vmul.f32 %v145_v47, %v90_v39 }
  0x9b   :  { %v130_v48 = vadd.f32 %v129_v46, %v127_v45 }
  0x9c   :  { %v149_v63 = vsel %vm103_vm0, %v148_v56, 0.0 }
  0x9d   :  { %v131_v50 = vrot.slane %v130_v48, 4  ;;  %v115_v1 = vpop.permute.xlu0 %114 }
  0x9e   :  { %v94_v52 = vpop.permute.xlu1 %93 }
  0x9f   :  { %v132_v51 = vadd.f32 %v131_v50, %v130_v48  ;;  %v101_v53 = vmul.f32 %v94_v52, %v89_v43 }
  0xa1   :  { %v133_v55 = vrot.slane %v132_v51, 2  ;;  %v105_v57 = vadd.f32 %v104_v54, %v101_v53 }
  0xa3   :  { %v134_v58 = vadd.f32 %v133_v55, %v132_v51  ;;  %v106_v59 = vrot.slane %v105_v57, 4  ;;  %v141_v60 = vpop.permute.xlu1 %140 }
  0xa4   :  { %v147_v61 = vmul.f32 %v141_v60, %v89_v43 }
  0xa5   :  { %v135_v62 = vrot.slane %v134_v58, 1  ;;  %v107_v0 = vadd.f32 %v106_v59, %v105_v57 }
  0xa6   :  { %v150_v2 = vadd.f32 %v149_v63, %v147_v61 }
  0xa7   :  { %v136_v3 = vadd.f32 %v135_v62, %v134_v58  ;;  %v108_v4 = vrot.slane %v107_v0, 2 }
  0xa8   :  { %v151_v5 = vrot.slane %v150_v2, 4 }
  0xa9   :  { %v137_v6 = vadd.f32 %v136_v3, %v115_v1  ;;  %v109_v7 = vadd.f32 %v108_v4, %v107_v0 }
  0xaa   :  { %v152_v8 = vadd.f32 %v151_v5, %v150_v2 }
  0xab   :  { %138 = vst [vmem:[#allocation2] sm:$0x2] %v137_v6  ;;  %v110_v9 = vrot.slane %v109_v7, 1 }
  0xac   :  { %v153_v10 = vrot.slane %v152_v8, 2 }
  0xad   :  { %v111_v11 = vadd.f32 %v110_v9, %v109_v7 }
  0xae   :  { %v154_v12 = vadd.f32 %v153_v10, %v152_v8 }
  0xaf   :  { %v117_v13 = vadd.f32 %v115_v1, %v111_v11 }
  0xb0   :  { %v155_v14 = vrot.slane %v154_v12, 1 }
  0xb1   :  { %118 = vst [vmem:[#allocation2] sm:$0x1] %v117_v13 }
  0xb2   :  { %v156_v15 = vadd.f32 %v155_v14, %v154_v12 }
  0xb4   :  { %v157_v16 = vadd.f32 %v156_v15, %v115_v1 }
  0xb6   :  { %158 = vst [vmem:[#allocation2] sm:$0x4] %v157_v16 }
  0xb7   :  { %200 = shalt.err (!%p197_p4)
}
  0xb8   :  { %s201_s9 = scalar_lea.hbm %s291_s5, 64 }
  0xb9   :  { %p202_p5 = scmp.ne.s32.totalorder %s291_s5, %s201_s9  ;;  %p205_p6 = scmp.lt.u32.totalorder %s201_s9, %s291_s5 }
  0xbb   :  { %p207_p7 = pnand %p205_p6, %p202_p5 }
  0xbd   :  { %210 = shalt.err (!%p207_p7)
}
  0xbe   :  { %168 = dma.vmem_to_hbm [thread:$0]  %s166_s4, 64, %s291_s5, [#allocation3]  }
  0xbf   :  { %211 = dma.done.wait [#allocation3], 64  }
  0xc0   :  { %212 = vsyncadd [#allocation3], 4294967232 }
  0xc1   :  { %172 = vsyncpa [#allocation3], 1 }

</bundles_post_ra>
